<compile_context>
chip_gen: v6e
topology: v6e:2x2x1
jax: 0.10.0
libtpu: 0.0.40
codegen_flags: <defaults>
</compile_context>

<pallas_src>
import jax
import jax.numpy as jnp
from jax.experimental import pallas as pl
from jax.experimental.pallas import tpu as pltpu


_VMEM_BLOCK_BUDGET = 20 * 1024 * 1024   # conservative across v5e/v6e/v7x (64 MiB/TC)


def share_sep_conv(x, weight):
    """Equivalent of ShareSepConv.forward.

    x:      (N, C, H, W)  -- NCHW, like the PyTorch module
    weight: (k, k)        -- the shared (1,1,k,k) parameter, squeezed
    Returns (N, C, H, W).
    """
    N, C, H, W = x.shape
    k = weight.shape[0]
    assert k % 2 == 1, "kernel size should be odd"
    p = (k - 1) // 2

    NC, HW = N * C, H * W
    P0 = p * (W + 1)                       # halo needed on each side of a flat row
    A = ((P0 + 127) // 128) * 128          # lane-tile-aligned placement of x in scratch
    L = A + HW + P0                        # scratch row length

    # Column-validity masks: a tap with column offset dj = j - p wraps across image
    # rows in the flattened H*W layout; mask_j zeroes those wrapped contributions.
    cols = jnp.arange(HW, dtype=jnp.int32) % W
    col_mask = jnp.stack(
        [((cols + (j - p) >= 0) & (cols + (j - p) < W)).astype(jnp.float32)
         for j in range(k)], axis=0)                                    # (k, HW)

    # ---- pick Bnc: largest divisor of N*C that fits the VMEM budget while keeping
    # at least 2 grid steps (v7x has 2 TensorCores; irrelevant but harmless on v5e/v6e).
    itemsize = jnp.dtype(x.dtype).itemsize

    def block_bytes(b):
        bb = 2 * 2 * b * HW * itemsize            # double-buffered input + output blocks
        bb += b * ((L + 127) // 128) * 128 * 4    # f32 padded scratch
        bb += 2 * b * HW * 4                      # live f32 accumulators
        bb += 2 * k * HW * 4                      # column masks
        return bb

    min_steps = 2 if NC >= 2 else 1
    divisors = [d for d in range(1, NC + 1) if NC % d == 0]
    fits = [d for d in divisors if block_bytes(d) <= _VMEM_BLOCK_BUDGET]
    cands = [d for d in fits if NC // d >= min_steps] or fits or [1]
    bnc = max(cands)
    G = NC // bnc
    # TODO(synk): for very large H*W (block_bytes(1) > budget) also tile along H with a
    # halo DMA so the scratch / accumulator stay inside VMEM on v7x's 64 MiB.

    vmem_limit = int(min(48 * 1024 * 1024,
                         max(32 * 1024 * 1024, 2 * block_bytes(bnc))))

    def kernel(w_ref, m_ref, x_ref, o_ref, pad_ref):
        # w_ref:   (k, k) f32 shared taps in SMEM
        # m_ref:   (k, HW) f32 column-wrap masks
        # x_ref:   (bnc, HW) input block        o_ref: (bnc, HW) output block
        # pad_ref: (bnc, L)  f32 padded scratch
        #
        # In-kernel zero padding: zero the scratch, then place the input block
        # (cast to f32 exactly once) at the lane-tile-aligned offset A.
        pad_ref[...] = jnp.zeros_like(pad_ref)
        pad_ref[:, A:A + HW] = x_ref[...].astype(jnp.float32)

        acc = jnp.zeros(o_ref.shape, jnp.float32)
        for j in range(k):                     # tap column offset
            part = jnp.zeros(o_ref.shape, jnp.float32)
            for i in range(k):                 # tap row offset
                s = (A - P0) + i * W + j       # static flat offset of this tap
                part = part + w_ref[i, j] * pad_ref[:, s:s + HW]
            # one mask multiply per column offset (not per tap)
            acc = acc + m_ref[j:j + 1, :] * part
        o_ref[...] = acc.astype(o_ref.dtype)

    x3 = x.reshape(G, bnc, HW)                 # contiguous-collapse reshape: free

    out = pl.pallas_call(
        kernel,
        out_shape=jax.ShapeDtypeStruct((G, bnc, HW), x.dtype),
        grid=(G,),
        in_specs=[
            pl.BlockSpec(memory_space=pltpu.MemorySpace.SMEM),       # shared (k,k) taps
            pl.BlockSpec((k, HW), lambda n: (0, 0)),                 # column masks
            pl.BlockSpec((None, bnc, HW), lambda n: (n, 0, 0)),      # input block
        ],
        out_specs=pl.BlockSpec((None, bnc, HW), lambda n: (n, 0, 0)),
        scratch_shapes=[pltpu.VMEM((bnc, L), jnp.float32)],
        compiler_params=pltpu.CompilerParams(
            dimension_semantics=("parallel",),
            vmem_limit_bytes=vmem_limit,
        ),
    )(weight.astype(jnp.float32), col_mask, x3)

    return out.reshape(N, C, H, W)


def init_share_sep_conv_weight(kernel_size):
    """Deterministic init exactly matching the PyTorch __init__:
    zeros with a 1 at the center (identity kernel)."""
    w = jnp.zeros((kernel_size, kernel_size), jnp.float32)
    c = (kernel_size - 1) // 2
    return w.at[c, c].set(1.0)


if __name__ == "__main__":
    key = jax.random.PRNGKey(0)
    N, C, H, W = 2, 4, 16, 16
    kernel_size = 3

    x = jax.random.normal(key, (N, C, H, W), dtype=jnp.float32)
    weight = init_share_sep_conv_weight(kernel_size)

    y = jax.block_until_ready(share_sep_conv(x, weight))

    # With the module's initial weight (delta at center), the depthwise conv
    # is an identity map — verify semantics.
    assert y.shape == x.shape and y.dtype == x.dtype
    assert jnp.allclose(y, x, atol=1e-6), "ShareSepConv identity-init check failed"

    # Also check a non-trivial shared weight against the XLA depthwise-conv reference.
    w2 = jax.random.normal(jax.random.PRNGKey(1), (kernel_size, kernel_size),
                           dtype=jnp.float32)
    y2 = jax.block_until_ready(share_sep_conv(x, w2))
    ref = jax.lax.conv_general_dilated(
        x,
        jnp.broadcast_to(w2[None, None], (C, 1, kernel_size, kernel_size)),
        window_strides=(1, 1),
        padding="SAME",
        dimension_numbers=("NCHW", "OIHW", "NCHW"),
        feature_group_count=C,
    )
    assert jnp.allclose(y2, ref, atol=1e-4, rtol=1e-4), "ShareSepConv conv check failed"

    print("KERNEL_OK")
</pallas_src>

<mosaic_0001>
module attributes {stable_mosaic.version = 11 : i64} {
  func.func @kernel(%arg0: i32, %arg1: memref<3x3xf32, #tpu.memory_space<smem>>, %arg2: memref<3x256xf32, #tpu.memory_space<vmem>>, %arg3: memref<1x4x256xf32, #tpu.memory_space<vmem>>, %arg4: memref<1x4x256xf32, #tpu.memory_space<vmem>>, %arg5: memref<4x401xf32, #tpu.memory_space<vmem>>) attributes {dimension_semantics = [#tpu.dimension_semantics<parallel>], iteration_bounds = array<i64: 2>, scalar_prefetch = 0 : i64, scratch_operands = 1 : i64, tpu.core_type = #tpu.core_type<tc>, window_params = [{transform_indices = @transform_0, window_bounds = array<i64: 3, 3>}, {pipeline_mode = #tpu.pipeline_mode<synchronous>, transform_indices = @transform_1, window_bounds = array<i64: 3, 256>}, {transform_indices = @transform_2, window_bounds = array<i64: 1, 4, 256>}, {transform_indices = @transform_3, window_bounds = array<i64: 1, 4, 256>}]} {
    %cst = arith.constant 0.000000e+00 : f32
    %0 = vector.broadcast %cst : f32 to vector<4x401xf32>
    %c0 = arith.constant 0 : index
    %c0_0 = arith.constant 0 : index
    %1 = vector.load %arg5[%c0, %c0_0] : memref<4x401xf32, #tpu.memory_space<vmem>>, vector<4x401xf32>
    tpu.vector_store %arg5[%c0, %c0_0], %0 {strides = array<i32>} : memref<4x401xf32, #tpu.memory_space<vmem>>, vector<4x401xf32>,
    %c0_1 = arith.constant 0 : index
    %c0_2 = arith.constant 0 : index
    %c0_3 = arith.constant 0 : index
    %2 = vector.load %arg3[%c0_1, %c0_2, %c0_3] : memref<1x4x256xf32, #tpu.memory_space<vmem>>, vector<1x4x256xf32>
    %3 = vector.shape_cast %2 : vector<1x4x256xf32> to vector<4x256xf32>
    %c0_4 = arith.constant 0 : index
    %c128 = arith.constant 128 : index
    %4 = vector.load %arg5[%c0_4, %c128] : memref<4x401xf32, #tpu.memory_space<vmem>>, vector<4x256xf32>
    tpu.vector_store %arg5[%c0_4, %c128], %3 {strides = array<i32>} : memref<4x401xf32, #tpu.memory_space<vmem>>, vector<4x256xf32>,
    %cst_5 = arith.constant 0.000000e+00 : f32
    %5 = vector.broadcast %cst_5 : f32 to vector<4x256xf32>
    %cst_6 = arith.constant 0.000000e+00 : f32
    %6 = vector.broadcast %cst_6 : f32 to vector<4x256xf32>
    %c0_7 = arith.constant 0 : index
    %c0_8 = arith.constant 0 : index
    %7 = memref.load %arg1[%c0_7, %c0_8] : memref<3x3xf32, #tpu.memory_space<smem>>
    %c0_9 = arith.constant 0 : index
    %c111 = arith.constant 111 : index
    %8 = vector.load %arg5[%c0_9, %c111] : memref<4x401xf32, #tpu.memory_space<vmem>>, vector<4x256xf32>
    %9 = vector.broadcast %7 : f32 to vector<4x256xf32>
    %10 = arith.mulf %9, %8 : vector<4x256xf32>
    %11 = arith.addf %6, %10 : vector<4x256xf32>
    %c1 = arith.constant 1 : index
    %c0_10 = arith.constant 0 : index
    %12 = memref.load %arg1[%c1, %c0_10] : memref<3x3xf32, #tpu.memory_space<smem>>
    %c0_11 = arith.constant 0 : index
    %c127 = arith.constant 127 : index
    %13 = vector.load %arg5[%c0_11, %c127] : memref<4x401xf32, #tpu.memory_space<vmem>>, vector<4x256xf32>
    %14 = vector.broadcast %12 : f32 to vector<4x256xf32>
    %15 = arith.mulf %14, %13 : vector<4x256xf32>
    %16 = arith.addf %11, %15 : vector<4x256xf32>
    %c2 = arith.constant 2 : index
    %c0_12 = arith.constant 0 : index
    %17 = memref.load %arg1[%c2, %c0_12] : memref<3x3xf32, #tpu.memory_space<smem>>
    %c0_13 = arith.constant 0 : index
    %c143 = arith.constant 143 : index
    %18 = vector.load %arg5[%c0_13, %c143] : memref<4x401xf32, #tpu.memory_space<vmem>>, vector<4x256xf32>
    %19 = vector.broadcast %17 : f32 to vector<4x256xf32>
    %20 = arith.mulf %19, %18 : vector<4x256xf32>
    %21 = arith.addf %16, %20 : vector<4x256xf32>
    %c0_14 = arith.constant 0 : index
    %c0_15 = arith.constant 0 : index
    %22 = vector.load %arg2[%c0_14, %c0_15] : memref<3x256xf32, #tpu.memory_space<vmem>>, vector<1x256xf32>
    %23 = vector.broadcast %22 : vector<1x256xf32> to vector<4x256xf32>
    %24 = arith.mulf %23, %21 : vector<4x256xf32>
    %25 = arith.addf %5, %24 : vector<4x256xf32>
    %cst_16 = arith.constant 0.000000e+00 : f32
    %26 = vector.broadcast %cst_16 : f32 to vector<4x256xf32>
    %c0_17 = arith.constant 0 : index
    %c1_18 = arith.constant 1 : index
    %27 = memref.load %arg1[%c0_17, %c1_18] : memref<3x3xf32, #tpu.memory_space<smem>>
    %c0_19 = arith.constant 0 : index
    %c112 = arith.constant 112 : index
    %28 = vector.load %arg5[%c0_19, %c112] : memref<4x401xf32, #tpu.memory_space<vmem>>, vector<4x256xf32>
    %29 = vector.broadcast %27 : f32 to vector<4x256xf32>
    %30 = arith.mulf %29, %28 : vector<4x256xf32>
    %31 = arith.addf %26, %30 : vector<4x256xf32>
    %c1_20 = arith.constant 1 : index
    %c1_21 = arith.constant 1 : index
    %32 = memref.load %arg1[%c1_20, %c1_21] : memref<3x3xf32, #tpu.memory_space<smem>>
    %c0_22 = arith.constant 0 : index
    %c128_23 = arith.constant 128 : index
    %33 = vector.load %arg5[%c0_22, %c128_23] : memref<4x401xf32, #tpu.memory_space<vmem>>, vector<4x256xf32>
    %34 = vector.broadcast %32 : f32 to vector<4x256xf32>
    %35 = arith.mulf %34, %33 : vector<4x256xf32>
    %36 = arith.addf %31, %35 : vector<4x256xf32>
    %c2_24 = arith.constant 2 : index
    %c1_25 = arith.constant 1 : index
    %37 = memref.load %arg1[%c2_24, %c1_25] : memref<3x3xf32, #tpu.memory_space<smem>>
    %c0_26 = arith.constant 0 : index
    %c144 = arith.constant 144 : index
    %38 = vector.load %arg5[%c0_26, %c144] : memref<4x401xf32, #tpu.memory_space<vmem>>, vector<4x256xf32>
    %39 = vector.broadcast %37 : f32 to vector<4x256xf32>
    %40 = arith.mulf %39, %38 : vector<4x256xf32>
    %41 = arith.addf %36, %40 : vector<4x256xf32>
    %c1_27 = arith.constant 1 : index
    %c0_28 = arith.constant 0 : index
    %42 = vector.load %arg2[%c1_27, %c0_28] : memref<3x256xf32, #tpu.memory_space<vmem>>, vector<1x256xf32>
    %43 = vector.broadcast %42 : vector<1x256xf32> to vector<4x256xf32>
    %44 = arith.mulf %43, %41 : vector<4x256xf32>
    %45 = arith.addf %25, %44 : vector<4x256xf32>
    %cst_29 = arith.constant 0.000000e+00 : f32
    %46 = vector.broadcast %cst_29 : f32 to vector<4x256xf32>
    %c0_30 = arith.constant 0 : index
    %c2_31 = arith.constant 2 : index
    %47 = memref.load %arg1[%c0_30, %c2_31] : memref<3x3xf32, #tpu.memory_space<smem>>
    %c0_32 = arith.constant 0 : index
    %c113 = arith.constant 113 : index
    %48 = vector.load %arg5[%c0_32, %c113] : memref<4x401xf32, #tpu.memory_space<vmem>>, vector<4x256xf32>
    %49 = vector.broadcast %47 : f32 to vector<4x256xf32>
    %50 = arith.mulf %49, %48 : vector<4x256xf32>
    %51 = arith.addf %46, %50 : vector<4x256xf32>
    %c1_33 = arith.constant 1 : index
    %c2_34 = arith.constant 2 : index
    %52 = memref.load %arg1[%c1_33, %c2_34] : memref<3x3xf32, #tpu.memory_space<smem>>
    %c0_35 = arith.constant 0 : index
    %c129 = arith.constant 129 : index
    %53 = vector.load %arg5[%c0_35, %c129] : memref<4x401xf32, #tpu.memory_space<vmem>>, vector<4x256xf32>
    %54 = vector.broadcast %52 : f32 to vector<4x256xf32>
    %55 = arith.mulf %54, %53 : vector<4x256xf32>
    %56 = arith.addf %51, %55 : vector<4x256xf32>
    %c2_36 = arith.constant 2 : index
    %c2_37 = arith.constant 2 : index
    %57 = memref.load %arg1[%c2_36, %c2_37] : memref<3x3xf32, #tpu.memory_space<smem>>
    %c0_38 = arith.constant 0 : index
    %c145 = arith.constant 145 : index
    %58 = vector.load %arg5[%c0_38, %c145] : memref<4x401xf32, #tpu.memory_space<vmem>>, vector<4x256xf32>
    %59 = vector.broadcast %57 : f32 to vector<4x256xf32>
    %60 = arith.mulf %59, %58 : vector<4x256xf32>
    %61 = arith.addf %56, %60 : vector<4x256xf32>
    %c2_39 = arith.constant 2 : index
    %c0_40 = arith.constant 0 : index
    %62 = vector.load %arg2[%c2_39, %c0_40] : memref<3x256xf32, #tpu.memory_space<vmem>>, vector<1x256xf32>
    %63 = vector.broadcast %62 : vector<1x256xf32> to vector<4x256xf32>
    %64 = arith.mulf %63, %61 : vector<4x256xf32>
    %65 = arith.addf %45, %64 : vector<4x256xf32>
    %c0_41 = arith.constant 0 : index
    %c0_42 = arith.constant 0 : index
    %c0_43 = arith.constant 0 : index
    %66 = vector.load %arg4[%c0_41, %c0_42, %c0_43] : memref<1x4x256xf32, #tpu.memory_space<vmem>>, vector<1x4x256xf32>
    %67 = vector.shape_cast %66 : vector<1x4x256xf32> to vector<4x256xf32>
    %68 = vector.shape_cast %65 : vector<4x256xf32> to vector<1x4x256xf32>
    tpu.vector_store %arg4[%c0_41, %c0_42, %c0_43], %68 {strides = array<i32>} : memref<1x4x256xf32, #tpu.memory_space<vmem>>, vector<1x4x256xf32>,
    return
  }
  func.func @transform_0(%arg0: i32) -> (i32, i32) {
    %c0_i32 = arith.constant 0 : i32
    %c0_i32_0 = arith.constant 0 : i32
    %c0_i32_1 = arith.constant 0 : i32
    return %c0_i32, %c0_i32_0 : i32, i32
  }
  func.func @transform_1(%arg0: i32) -> (i32, i32) {
    %c0_i32 = arith.constant 0 : i32
    %c0_i32_0 = arith.constant 0 : i32
    %c0_i32_1 = arith.constant 0 : i32
    return %c0_i32, %c0_i32_0 : i32, i32
  }
  func.func @transform_2(%arg0: i32) -> (i32, i32, i32) {
    %c0_i32 = arith.constant 0 : i32
    %c0_i32_0 = arith.constant 0 : i32
    %c0_i32_1 = arith.constant 0 : i32
    return %arg0, %c0_i32, %c0_i32_0 : i32, i32, i32
  }
  func.func @transform_3(%arg0: i32) -> (i32, i32, i32) {
    %c0_i32 = arith.constant 0 : i32
    %c0_i32_0 = arith.constant 0 : i32
    %c0_i32_1 = arith.constant 0 : i32
    return %arg0, %c0_i32, %c0_i32_0 : i32, i32, i32
  }
}

</mosaic_0001>

<bundles_post_ra>
// kernel: tpu_custom_call.1
= control target key start
LH: loop header
LB: loop body
LE: loop exit
PB: predicated region body
PF: predicated region fallthrough
CT: control target
= control target key end

     0   :  { %8 = vsyncpa [#allocation6], 0  ;;  %s1029_s0 = inlined_call_operand.hbm [shape: f32[3,3], index: 0, kind: input, shape index: {}]   ;;  %s1030_s1 = inlined_call_operand.hbm [shape: f32[3,256], index: 1, kind: input, shape index: {}]   ;;  %s1031_s2 = inlined_call_operand.hbm [shape: f32[2,4,256], index: 2, kind: input, shape index: {}]   ;;  %s1032_s3 = inlined_call_operand.hbm [shape: f32[2,4,256], index: 3, kind: output, shape index: {}]  }
   0x1   :  { %9 = vsyncpa [#allocation4], 0 }
   0x2   :  { %10 = vsyncpa [#allocation9], 0 }
   0x3   :  { %12 = vsyncpa [#allocation9 + $0x1], 0 }
   0x4   :  { %13 = vsyncpa [#allocation5], 0 }
   0x5   :  { %15 = vsyncpa [#allocation5 + $0x1], 0  ;;  %s826_s12 = smov 0   ;;  %s828_s13 = smov 0  }
   0x6   :  { %s830_s14 = smov 0   ;;  %s832_s15 = smov 0  }
   0x7 LB: > { %s847_s16 = sadd.s32 4294967295, %s794_s15   ;;  %s556_s17 = sadd.s32 4294967294, %s794_s15   ;;  %s794_s15 = sphi %s832_s15, %s1056_s15   ;;  %s790_s14 = sphi %s830_s14, %s1055_s14   ;;  %s786_s13 = sphi %s828_s13, %s1054_s13   ;;  %s782_s12 = sphi %s826_s12, %s1053_s12  }
   0x8   : > { %p83_p0 = scmp.ne.s32.totalorder %s786_s13, %s782_s12  ;;  %p1033_p1 = scmp.eq.s32.totalorder %s847_s16, 0 }
   0x9   : > { %p107_p2 = scmp.eq.s32.totalorder %s847_s16, 1  ;;  %p113_p3 = scmp.eq.s32.totalorder %s556_s17, 1 }
   0xa   : > { %p856_p4 = por %p1033_p1, %p83_p0  ;;  %p557_p5 = scmp.ge.s32.totalorder %s794_s15, 1 }
   0xb   : > { %p861_p6 = por %p113_p3, %p83_p0  ;;  %p120_p7 = scmp.lt.s32.totalorder %s794_s15, 3 }
   0xc   : > { %s1037_s18 = scalar_select %p856_p4, 1, 0 }
   0xd   : > { %s1038_s19 = scalar_select %p861_p6, 1, 0 }
   0xe   : > { %p866_p8 = pnand %p557_p5, %p120_p7  ;;  %s796_s21 = smov [#allocation7]  }
   0xf   : > { %s142_s22 = sshll.u32 %s796_s21, 4  ;;  %s880_s24 = sadd.s32 1, %s794_s15   ;;  %s143_s22 = int_to_ptr.vmem [resolvable:$true] %s142_s22 }
  0x10   : > { %s1039_s20 = scalar_select %p866_p8, 1, 0 }
  0x11   : > { %p596_p10 = pneg %p866_p8  ;;  %s67_s25 = ssub.s32 %s794_s15, %s880_s24 }
  0x12   : > { %s70_s26 = sadd.s32 1, %s790_s14  ;;  %p885_p12 = scmp.eq.s32.totalorder %s67_s25, 0 }
  0x13   : > { %p875_p11 = pnand %p596_p10, %p1033_p1  ;;  %s797_s28 = smov [#allocation3]  }
  0x14   : > { %s679_s4 = scalar_lea.vmem %s143_s22, 128  ;;  %p687_p7 = scmp.lt.s32.totalorder %s143_s22, %s143_s22 }
  0x15   : > { %599 = dma.hbm_to_smem (!%p875_p11), %s1029_s0, 64, %s797_s28, [#allocation6]  }
  0x16   : > { %p670_p13 = pneg %p875_p11  ;;  %p680_p0 = scmp.ne.s32.totalorder %s143_s22, %s679_s4 }
  0x17   : > { %p688_p10 = scmp.lt.s32.totalorder %s679_s4, %s679_s4 }
  0x18   : > { %p682_p3 = pnand %p680_p0, %p670_p13 }
  0x19   : > { %p689_p9 = por %p688_p10, %p687_p7 }
  0x1a   : > { %p683_p5 = pneg %p682_p3 }
  0x1c   : > { %p690_p1 = pnand %p689_p9, %p683_p5 }
  0x1e   : > { %693 = shalt.err (!%p690_p1)
}
  0x1f   : > { %602 = dma.hbm_to_vmem [thread:$0]  (!%p875_p11), %s1030_s1, 128, %s143_s22, [#allocation4]  }
  0x20   : > { %s904_s7 = scalar_select %p885_p12, %s790_s14, %s70_s26  }
  0x21   : > { %p77_p9 = scmp.ne.s32.totalorder %s790_s14, %s786_s13  ;;  %p78_p1 = scmp.eq.s32.totalorder %s794_s15, 0 }
  0x22   : > { %p613_p13 = scmp.lt.s32.totalorder %s794_s15, 2  ;;  %s153_s8 = sand.u32 1, %s790_s14  }
  0x23   : > { %p79_p0 = por %p78_p1, %p77_p9  ;;  %p913_p3 = por %p107_p2, %p77_p9 }
  0x24   : > { %s561_s10 = sshll.u32 %s153_s8, 3  ;;  %s582_s11 = sshll.u32 %s794_s15, 7 }
  0x25   : > { %s1042_s9 = scalar_select %p913_p3, 1, 0 }
  0x26   : > { %s921_s23 = scalar_lea.hbm %s1031_s2, %s582_s11  ;;  %s157_s22 = scalar_lea.vmem [#allocation8], %s561_s10 }
  0x27   : > { %s165_s25 = sshll.u32 %s157_s22, 4  ;;  %p923_p11 = pnand %p613_p13, %p79_p0  ;;  %s166_s25 = int_to_ptr.vmem [resolvable:$true] %s165_s25 }
  0x28   : > { %s154_s27 = scalar_lea.sflag [#allocation9], %s153_s8  ;;  %s694_s28 = scalar_lea.hbm %s921_s23, 128 }
  0x29   : > { %p695_p2 = scmp.ne.s32.totalorder %s921_s23, %s694_s28  ;;  %p696_p12 = pneg %p923_p11 }
  0x2a   : > { %s699_s4 = scalar_lea.hbm %s1031_s2, 256  ;;  %p700_p10 = scmp.lt.s32.totalorder %s921_s23, %s1031_s2 }
  0x2b   : > { %p697_p5 = pnand %p696_p12, %p695_p2  ;;  %p701_p9 = scmp.lt.s32.totalorder %s699_s4, %s694_s28 }
  0x2d   : > { %p698_p7 = pneg %p697_p5  ;;  %p702_p1 = por %p701_p9, %p700_p10 }
  0x2f   : > { %p703_p13 = pnand %p702_p1, %p698_p7 }
  0x31   : > { %706 = shalt.err (!%p703_p13)
}
  0x32   : > { %s707_s10 = scalar_lea.vmem %s166_s25, 128  ;;  %s798_s8 = smov [#allocation8]  }
  0x33   : > { %p708_p0 = scmp.ne.s32.totalorder %s166_s25, %s707_s10  ;;  %s712_s11 = sshll.u32 %s798_s8, 4  ;;  %s713_s11 = int_to_ptr.vmem [resolvable:$false] %s712_s11 }
  0x34   : > { %s714_s17 = scalar_lea.vmem %s713_s11, 256  ;;  %p715_p2 = scmp.lt.s32.totalorder %s166_s25, %s713_s11 }
  0x35   : > { %p710_p6 = pnand %p708_p0, %p696_p12  ;;  %p716_p5 = scmp.lt.s32.totalorder %s714_s17, %s707_s10 }
  0x37   : > { %p711_p3 = pneg %p710_p6  ;;  %p717_p4 = por %p716_p5, %p715_p2 }
  0x39   : > { %p718_p8 = pnand %p717_p4, %p711_p3 }
  0x3b   : > { %721 = shalt.err (!%p718_p8)
}
  0x3c   : > { %606 = dma.hbm_to_vmem [thread:$0]  (!%p923_p11), %s921_s23, 128, %s166_s25, %s154_s27  }
  0x3d   : > { %p1044_p7 = scmp.ne.s32.totalorder %s1039_s20, 0 }
  0x3e   : > { %p1045_p10 = scmp.eq.s32.totalorder (!%p1044_p7), %s847_s16, 0 }
  0x3f   : > { %174 = sbr.rel (%p1044_p7) target bundleno = 373 (0x175), region = 32 }
  0x44   : > { %765 = dma.done.wait (%p1045_p10), [#allocation6], 64   ;;  %p1046_p6 = pmov %p1045_p10 }
  0x46   : > { %767 = vsyncadd (%p1046_p6), [#allocation6], 4294967232  ;;  %p1047_p12 = pmov %p1046_p6 }
  0x47   : > { %p1048_p9 = pmov %p1046_p6 }
  0x48   : > { %769 = dma.done.wait (%p1047_p12), [#allocation4], 128  }
  0x49   : > { %771 = vsyncadd (%p1048_p9), [#allocation4], 4294967168  ;;  %s952_s21 = sand.u32 1, %s786_s13   ;;  %p1049_p4 = scmp.ne.s32.totalorder %s1037_s18, 0 }
  0x4a   : > { %s567_s20 = sshll.u32 %s952_s21, 3  ;;  %s185_s23 = scalar_lea.sflag [#allocation9], %s952_s21 }
  0x4b   : > { %s188_s22 = scalar_lea.vmem [#allocation8], %s567_s20 }
  0x4c   : > { %773 = dma.done.wait (%p1049_p4), %s185_s23, 128  }
  0x4d   : > { %775 = vsyncadd (%p1049_p4), %s185_s23, 4294967168 }
  0x4e   : > { %193 = sfence }
  0x4f   : > { %vm213_vm0 = vcmask 1043456   ;;  %vm214_vm1 = vcmask 138244   ;;  %v217_v0 = vld [vmem:[%s188_s22] sm:$0xff]  ;;  %s570_s25 = sld [smem:[#allocation3 + $0x100]]  ;;  %v799_v1 = vmov 0.0   ;;  %s800_s30 = smov 96  }
  0x50   : > { %vm215_vm2 = vmor %vm214_vm1, %vm213_vm0  ;;  %212 = vst [vmem:[#allocation2] sm:$0xff] %v799_v1  ;;  %s569_s26 = sld [smem:[#allocation3 + $0x80]]  ;;  %s801_s4 = smov 112   ;;  %vm259_vm3 = vcmask 785408   ;;  %vm240_vm4 = vcmask 916480   ;;  %vm358_vm5 = vcmask 130048  }
  0x51   : > { %216 = vst.msk [vmem:[#allocation2 + $0x8] sm:$0xff] %vm215_vm2, %v799_v1  ;;  %s572_s27 = sld [smem:[#allocation3 + $0x81]]  ;;  %s802_s8 = smov 17   ;;  %vm287_vm6 = vcmask 138240   ;;  %vm433_vm7 = vcmask 121856  }
  0x52   : > { %218 = vst [vmem:[#allocation2 + $0x4] sm:$0xff] %v217_v0  ;;  %s963_s28 = sld [smem:[#allocation3 + $0x101]]  ;;  %s803_s11 = smov 15  }
  0x53   : > { %s575_s18 = sld [smem:[#allocation3 + $0x82]]  ;;  %s804_s17 = smov 16  }
  0x54   : > { %s576_s29 = sld [smem:[#allocation3 + $0x102]]  ;;  %s583_s23 = sshll.u32 %s847_s16, 7 }
  0x55   : > { %v249_v2 = vstv %s570_s25  ;;  %s219_s5 = sld [smem:[#allocation3]]  ;;  %s211_s22 = scalar_lea.vmem [#allocation10], %s567_s20 }
  0x56   : > { %v228_v3 = vstv %s569_s26  ;;  %v250_v13 = vmul.f32 %v249_v2, %v217_v0  ;;  %s969_s6 = sld [smem:[#allocation3 + $0x2]]  ;;  %s462_s25 = sshll.u32 %s211_s22, 4  ;;  %s463_s25 = int_to_ptr.vmem [resolvable:$true] %s462_s25 }
  0x57   : > { %v306_v5 = vstv %s572_s27  ;;  %s971_s10 = sld [smem:[#allocation3 + $0x1]]  ;;  %p1050_p3 = scmp.ne.s32.totalorder %s1042_s9, 0 }
  0x58   : > { %v248_v4 = vld [vmem:[#allocation2 + $0xc] sm:$0xf]  ;;  %v307_v10 = vmul.f32 %v306_v5, %v217_v0  ;;  %v320_v12 = vstv %s963_s28  ;;  %s460_s28 = scalar_lea.hbm %s1032_s3, %s583_s23 }
  0x59   : > { %v251_v6 = vmul.f32 %v249_v2, %v248_v4  ;;  %v965_v7 = vld [vmem:[#allocation2] sm:$0xff]  ;;  %v221_v8 = vld [vmem:[#allocation2 + $0x8] sm:$0xf]  ;;  %v321_v14 = vmul.f32 %v320_v12, %v217_v0  ;;  %v378_v15 = vstv %s575_s18  ;;  %v377_v19 = vld [vmem:[#allocation2 + $0xc] sm:$0xf]  ;;  %s448_s18 = scalar_lea.sflag [#allocation5], %s952_s21 }
  0x5a   : > { %v229_v9 = vmul.f32 %v228_v3, %v965_v7  ;;  %v230_v11 = vmul.f32 %v228_v3, %v221_v8  ;;  %v395_v16 = vstv %s576_s29  ;;  %v379_v17 = vmul.f32 %v378_v15, %v217_v0  ;;  %v319_v20 = vld [vmem:[#allocation2 + $0xc] sm:$0xf]  ;;  %v298_v37 = vld [vmem:[#allocation2 + $0x8] sm:$0xf]  ;;  %s722_s29 = scalar_lea.vmem %s463_s25, 128 }
  0x5b   : > { %256 = vrot.lane.b32.xlu1 %v251_v6, %s800_s30  ;;  %v396_v18 = vmul.f32 %v395_v16, %v217_v0  ;;  %v380_v21 = vmul.f32 %v378_v15, %v377_v19  ;;  %v322_v22 = vmul.f32 %v320_v12, %v319_v20  ;;  %v397_v23 = vmul.f32 %v395_v16, %v377_v19  ;;  %v369_v2 = vld [vmem:[#allocation2 + $0x8] sm:$0xf]  ;;  %p723_p8 = scmp.ne.s32.totalorder %s463_s25, %s722_s29 }
  0x5c   : > { %233 = vrot.lane.b32.xlu0 %v229_v9, %s801_s4  ;;  %v222_v26 = vstv %s219_s5  ;;  %v370_v34 = vstv %s969_s6  ;;  %v268_v15 = vlaneseq }
  0x5d   : > { %v224_v29 = vmul.f32 %v222_v26, %v221_v8  ;;  %v299_v36 = vstv %s971_s10  ;;  %v371_v41 = vmul.f32 %v370_v34, %v965_v7  ;;  %v223_v48 = vmul.f32 %v222_v26, %v965_v7  ;;  %p724_p11 = pnand %p723_p8, %p1050_p3 }
  0x5e   : > { %v301_v44 = vmul.f32 %v299_v36, %v298_v37  ;;  %v300_v53 = vmul.f32 %v299_v36, %v965_v7  ;;  %v372_v6 = vmul.f32 %v370_v34, %v369_v2 }
  0x5f   : > { %309 = vrot.lane.b32.xlu1 %v307_v10, %s801_s4  ;;  %p725_p1 = pneg %p724_p11 }
  0x60   : > { %235 = vrot.lane.b32.xlu0 %v230_v11, %s801_s4 }
  0x63   : > { %254 = vrot.lane.b32.xlu1 %v250_v13, %s800_s30 }
  0x64   : > { %325 = vrot.lane.b32.xlu0 %v321_v14, %s800_s30 }
  0x67   : > { %383 = vrot.lane.b32.xlu1 %v379_v17, %s801_s4  ;;  %v269_v17 = vshrl.u32 %v268_v15, 7 }
  0x68   : > { %400 = vrot.lane.b32.xlu0 %v396_v18, %s800_s30 }
  0x69   : > { %v270_v20 = vsub.s32 0, %v269_v17 }
  0x6b   : > { %385 = vrot.lane.b32.xlu1 %v380_v21, %s801_s4  ;;  %v274_v21 = vsub.s32 1, %v269_v17 }
  0x6c   : > { %327 = vrot.lane.b32.xlu0 %v322_v22, %s800_s30  ;;  %v337_v22 = vld [vmem:[#allocation7 + $0x1] ss:$4 sm:$0x3] }
  0x6d   : > { %v342_v26 = vrot.slane %v337_v22, %v270_v20 }
  0x70   : > { %402 = vrot.lane.b32.xlu0 %v397_v23, %s800_s30  ;;  %s805_s30 = smov [#allocation10]  }
  0x71   : > { %s726_s16 = sshll.u32 %s805_s30, 4  ;;  %s727_s16 = int_to_ptr.vmem [resolvable:$false] %s726_s16 }
  0x72   : > { %s728_s20 = scalar_lea.vmem %s727_s16, 256  ;;  %p729_p13 = scmp.lt.s32.totalorder %s463_s25, %s727_s16 }
  0x73   : > { %p730_p0 = scmp.lt.s32.totalorder %s728_s20, %s722_s29 }
  0x75   : > { %p731_p2 = por %p730_p0, %p729_p13 }
  0x77   : > { %p732_p5 = pnand %p731_p2, %p725_p1 }
  0xcd   : > { %v257_v24 = vpop.permute.xlu1 %256 }
  0xce   : > { %v234_v25 = vpop.permute.xlu0 %233 }
  0xcf   : > { %v237_v35 = vrot.slane %v234_v25, 4 }
  0xd1   : > { %v310_v27 = vpop.permute.xlu1 %309 }
  0xd2   : > { %v236_v28 = vpop.permute.xlu0 %235  ;;  %v311_v45 = vrot.slane %v310_v27, 4 }
  0xd3   : > { %v238_v30 = vrot.slane %v236_v28, 4  ;;  %v245_v38 = vadd.f32 %v236_v28, %v224_v29  ;;  %v346_v28 = vrot.slane %v337_v22, %v274_v21 }
  0xd4   : > { %v312_v56 = vsel %vm240_vm4, %v311_v45, %v310_v27  ;;  %v316_v57 = vadd.f32 %v311_v45, %v301_v44  ;;  %v412_v27 = vld [vmem:[#allocation7 + $0x2] ss:$4 sm:$0x3] }
  0xd5   : > { %v255_v31 = vpop.permute.xlu1 %254  ;;  %v239_v40 = vsel %vm213_vm0, %v237_v35, %v238_v30  ;;  %v315_v1 = vadd.f32 %v312_v56, %v300_v53  ;;  %v417_v35 = vrot.slane %v412_v27, %v270_v20 }
  0xd6   : > { %v258_v32 = vrot.slane %v255_v31, 4  ;;  %v326_v33 = vpop.permute.xlu0 %325  ;;  %v241_v50 = vsel %vm240_vm4, %v234_v25, %v239_v40 }
  0xd7   : > { %v329_v51 = vrot.slane %v326_v33, 4  ;;  %v244_v59 = vadd.f32 %v241_v50, %v223_v48 }
  0xd8   : > { %v261_v39 = vsel %vm259_vm3, %v258_v32, %v257_v24  ;;  %v260_v62 = vsel %vm259_vm3, %v258_v32, %v255_v31  ;;  %v266_v24 = vld [vmem:[#allocation7] ss:$4 sm:$0x3] }
  0xd9   : > { %v384_v42 = vpop.permute.xlu1 %383  ;;  %v265_v43 = vadd.f32 %v261_v39, %v245_v38  ;;  %v330_v63 = vsel %vm259_vm3, %v329_v51, %v326_v33  ;;  %v264_v3 = vadd.f32 %v260_v62, %v244_v59  ;;  %v271_v29 = vrot.slane %v266_v24, %v270_v20 }
  0xda   : > { %v387_v46 = vrot.slane %v384_v42, 4  ;;  %v401_v47 = vpop.permute.xlu0 %400  ;;  %v334_v4 = vadd.f32 %v330_v63, %v315_v1  ;;  %v275_v30 = vrot.slane %v266_v24, %v274_v21  ;;  %v421_v38 = vrot.slane %v412_v27, %v274_v21 }
  0xdb   : > { %v404_v49 = vrot.slane %v401_v47, 4  ;;  %285 = vrot.lane.b32.xlu1 %v265_v43, %s802_s8  ;;  %v280_v11 = vcombine.high %v264_v3, %v264_v3 }
  0xdc   : > { %v388_v52 = vsel %vm240_vm4, %v387_v46, %v384_v42  ;;  %v351_v9 = vcombine.high %v334_v4, %v334_v4 }
  0xdd   : > { %v392_v54 = vadd.f32 %v388_v52, %v371_v41  ;;  %v405_v55 = vsel %vm259_vm3, %v404_v49, %v401_v47  ;;  %v386_v5 = vpop.permute.xlu1 %385 }
  0xde   : > { %v328_v58 = vpop.permute.xlu0 %327  ;;  %v389_v8 = vsel %vm240_vm4, %v387_v46, %v386_v5 }
  0xdf   : > { %v409_v60 = vadd.f32 %v405_v55, %v392_v54  ;;  %v331_v61 = vsel %vm259_vm3, %v329_v51, %v328_v58  ;;  %v393_v12 = vadd.f32 %v389_v8, %v372_v6 }
  0xe0   : > { %v335_v0 = vadd.f32 %v331_v61, %v316_v57 }
  0xe1   : > { %427 = vrot.lane.b32.xlu1 %v409_v60, %s803_s11  ;;  %v426_v14 = vcombine.high %v409_v60, %v409_v60 }
  0xe2   : > { %356 = vrot.lane.b32.xlu0 %v335_v0, %s804_s17  ;;  %v403_v7 = vpop.permute.xlu0 %402 }
  0xe3   : > { %v406_v10 = vsel %vm259_vm3, %v404_v49, %v403_v7 }
  0xe4   : > { %v410_v13 = vadd.f32 %v406_v10, %v393_v12 }
  0xe5   : > { %281 = vrot.lane.b32.xlu1 %v264_v3, %s802_s8 }
  0xe6   : > { %352 = vrot.lane.b32.xlu0 %v334_v4, %s804_s17 }
  0xe9   : > { %354 = vrot.lane.b32.xlu1 %v351_v9, %s804_s17 }
  0xea   : > { %283 = vrot.lane.b32.xlu0 %v280_v11, %s802_s8 }
  0xed   : > { %431 = vrot.lane.b32.xlu1 %v410_v13, %s803_s11 }
  0xee   : > { %429 = vrot.lane.b32.xlu0 %v426_v14, %s803_s11 }
 0x14d   : > { %v286_v16 = vpop.permute.xlu1 %285 }
 0x153   : > { %v428_v18 = vpop.permute.xlu1 %427 }
 0x154   : > { %v357_v19 = vpop.permute.xlu0 %356 }
 0x157   : > { %v282_v23 = vpop.permute.xlu1 %281 }
 0x158   : > { %v353_v25 = vpop.permute.xlu0 %352 }
 0x15b   : > { %v355_v31 = vpop.permute.xlu1 %354 }
 0x15c   : > { %v359_v32 = vsel %vm358_vm5, %v353_v25, %v355_v31  ;;  %v360_v33 = vsel %vm358_vm5, %v355_v31, %v357_v19  ;;  %v284_v34 = vpop.permute.xlu0 %283 }
 0x15d   : > { %v288_v36 = vsel %vm287_vm6, %v282_v23, %v284_v34  ;;  %v289_v37 = vsel %vm287_vm6, %v284_v34, %v286_v16  ;;  %v363_v39 = vmul.f32 %v359_v32, %v342_v26  ;;  %v364_v40 = vmul.f32 %v360_v33, %v346_v28 }
 0x15e   : > { %v292_v41 = vmul.f32 %v288_v36, %v271_v29  ;;  %v293_v42 = vmul.f32 %v289_v37, %v275_v30 }
 0x15f   : > { %v432_v43 = vpop.permute.xlu1 %431 }
 0x160   : > { %v430_v44 = vpop.permute.xlu0 %429  ;;  %v365_v47 = vadd.f32 %v363_v39, %v292_v41  ;;  %v366_v48 = vadd.f32 %v364_v40, %v293_v42 }
 0x161   : > { %v434_v45 = vsel %vm433_vm7, %v428_v18, %v430_v44  ;;  %v435_v46 = vsel %vm433_vm7, %v430_v44, %v432_v43 }
 0x162   : > { %v438_v49 = vmul.f32 %v434_v45, %v417_v35  ;;  %v439_v50 = vmul.f32 %v435_v46, %v421_v38 }
 0x164   : > { %v440_v51 = vadd.f32 %v438_v49, %v365_v47  ;;  %v441_v52 = vadd.f32 %v439_v50, %v366_v48 }
 0x166   : > { %v444_v53 = vcombine.low %v440_v51, %v441_v52 }
 0x168   : > { %446 = vst [vmem:[%s211_s22] sm:$0xff] %v444_v53 }
 0x169   : > { %735 = shalt.err (!%p732_p5)
}
 0x16a   : > { %s736_s4 = scalar_lea.hbm %s460_s28, 128  ;;  %s740_s6 = scalar_lea.hbm %s1032_s3, 256 }
 0x16b   : > { %p737_p7 = scmp.ne.s32.totalorder %s460_s28, %s736_s4  ;;  %p741_p12 = scmp.lt.s32.totalorder %s460_s28, %s1032_s3 }
 0x16c   : > { %p742_p9 = scmp.lt.s32.totalorder %s740_s6, %s736_s4 }
 0x16d   : > { %p738_p10 = pnand %p737_p7, %p1050_p3 }
 0x16e   : > { %p743_p4 = por %p742_p9, %p741_p12 }
 0x16f   : > { %p739_p6 = pneg %p738_p10 }
 0x171   : > { %p744_p8 = pnand %p743_p4, %p739_p6 }
 0x173   : > { %747 = shalt.err (!%p744_p8)
}
 0x174   : > { %594 = dma.vmem_to_hbm [thread:$0]  (%p1050_p3), %s463_s25, 128, %s460_s28, %s448_s18  }
 0x175 PF: > { %s474_s11 = sand.u32 1, %s782_s12   ;;  %p1051_p11 = scmp.ne.s32.totalorder %s1038_s19, 0 }
 0x176   : > { %p1052_p1 = scmp.ge.s32.totalorder %s794_s15, 2  ;;  %s475_s17 = scalar_lea.sflag [#allocation5], %s474_s11 }
 0x178   : > { %p608_p13 = pnand %p1052_p1, %p1051_p11 }
 0x17a   : > { %p609_p0 = pneg %p608_p13 }
 0x17c   : > { %777 = dma.done.wait (%p609_p0), %s475_s17, 128  }
 0x17d   : > { %779 = vsyncadd (%p609_p0), %s475_s17, 4294967168  ;;  %p18_p2 = scmp.ge.s32.totalorder %s880_s24, 4   ;;  %s1053_s12 = smov %s786_s13 }
 0x17e   : > { %s1054_s13 = smov %s790_s14  ;;  %s1055_s14 = smov %s904_s7 }
 0x17f   : > { %s1056_s15 = smov %s880_s24  ;;  %20 = sbr.rel (!%p18_p2) target bundleno = 7 (0x7), region = 89 }
 0x184   :  { %480 = vsyncpa [#allocation4], 1 }
 0x185   :  { %482 = vsyncpa [#allocation4 + $0x1], 1 }
 0x186   :  { %483 = vsyncpa [#allocation9], 1 }
 0x187   :  { %485 = vsyncpa [#allocation9 + $0x1], 1 }
 0x188   :  { %486 = vsyncpa [#allocation5], 1 }
 0x189   :  { %488 = vsyncpa [#allocation5 + $0x1], 1 }
 0x18a   :  { %489 = vsyncpa [#allocation6], 1 }
 0x18b   :  { %491 = vsyncpa [#allocation6 + $0x1], 1 }

</bundles_post_ra>
